<compile_context>
chip_gen: v5e
topology: v5e:2x2
jax: 0.10.0
libtpu: 0.0.40
codegen_flags: <defaults>
</compile_context>

<pallas_src>
import jax
import jax.numpy as jnp
from jax.experimental import pallas as pl
from jax.experimental.pallas import tpu as pltpu


def four_model_kernel(x_ref, wf_ref, bf_ref, wh_ref, bh_ref, feat_ref, pred_ref):
    # Single invocation: global-average-pool + all 4 branches fused into two
    # lane-dense MXU matmuls.
    #   x_ref : (B, C, HW) f32
    #   wf_ref: (C, 4F)    bf16   column-stacked backbone weights (cat order)
    #   bf_ref: (1, 4F)    f32    stacked backbone biases
    #   wh_ref: (4F, 4P4)  bf16   block-diagonal head weights (cat order)
    #   bh_ref: (1, 4P4)   f32    stacked head biases

    # Global average pool over the spatial dim (lane reduction, XLU slot).
    pooled = jnp.mean(x_ref[...], axis=-1)                       # (B, C) f32

    # Backbone for all 4 branches at once: ReLU(pooled @ W + b).
    # bf16 operands, f32 accumulation; K=C=4 is zero-padded on the MXU.
    feat = jnp.dot(pooled.astype(wf_ref.dtype), wf_ref[...],
                   preferred_element_type=jnp.float32) + bf_ref[...]
    feat = jnp.maximum(feat, 0.0)                                # ReLU (f32, VPU)
    feat_ref[...] = feat.astype(feat_ref.dtype)                  # (B, 4F), cat-ordered

    # PointPredHead x4 fused: Dropout (identity at eval) -> block-diag Linear -> Tanh.
    pred = jnp.tanh(jnp.dot(feat.astype(wh_ref.dtype), wh_ref[...],
                            preferred_element_type=jnp.float32) + bh_ref[...])
    pred_ref[...] = pred.astype(pred_ref.dtype)                  # (B, 4P4), cat-ordered


def pack_four_model_params(wb, bb, wh, bh, matmul_dtype=jnp.bfloat16):
    """One-time (model-load) weight packing.  NOT part of the per-call path.

       wb: (4, C, F) backbone weights, bb: (4, 1, F) backbone biases,
       wh: (4, F, P4) head weights,    bh: (4, 1, P4) head biases."""
    n_branch, C, F = wb.shape
    P4 = wh.shape[-1]

    # Column-stack backbone weights in torch.cat(dim=1) order: [c, m*F + f] = wb[m, c, f].
    wb_stack = jnp.transpose(wb, (1, 0, 2)).reshape(C, n_branch * F).astype(matmul_dtype)
    bf_stack = bb[:, 0, :].reshape(1, n_branch * F).astype(jnp.float32)

    # Block-diagonal head weight: feature block m only feeds prediction block m.
    wh_bd = jax.scipy.linalg.block_diag(*wh).astype(matmul_dtype)        # (4F, 4P4)
    bh_stack = bh[:, 0, :].reshape(1, n_branch * P4).astype(jnp.float32)

    return wb_stack, bf_stack, wh_bd, bh_stack


def four_model_forward(x, wb_stack, bf_stack, wh_bd, bh_stack):
    """x: (B, C, H, W) float32.  Packed params from pack_four_model_params."""
    B, C, H, W = x.shape
    HW = H * W
    nF = wb_stack.shape[1]          # 4 * in_features
    nP = wh_bd.shape[1]             # num_points

    x3d = x.reshape(B, C, HW)       # trailing-dim merge: metadata-only reshape

    feature, pred_offset = pl.pallas_call(
        four_model_kernel,
        out_shape=(
            jax.ShapeDtypeStruct((B, nF), jnp.float32),
            jax.ShapeDtypeStruct((B, nP), jnp.float32),
        ),
        grid_spec=pltpu.PrefetchScalarGridSpec(
            num_scalar_prefetch=0,
            grid=(1,),
            in_specs=[
                pl.BlockSpec((B, C, HW), lambda i: (0, 0, 0)),   # x (pool in-kernel)
                pl.BlockSpec((C, nF), lambda i: (0, 0)),         # backbone W (stacked, bf16)
                pl.BlockSpec((1, nF), lambda i: (0, 0)),         # backbone b (stacked)
                pl.BlockSpec((nF, nP), lambda i: (0, 0)),        # block-diag head W (bf16)
                pl.BlockSpec((1, nP), lambda i: (0, 0)),         # head b (stacked)
            ],
            out_specs=[
                pl.BlockSpec((B, nF), lambda i: (0, 0)),         # feature (cat order)
                pl.BlockSpec((B, nP), lambda i: (0, 0)),         # pred_offset (cat order)
            ],
        ),
        compiler_params=pltpu.CompilerParams(
            dimension_semantics=("arbitrary",)),
    )(x3d, wb_stack, bf_stack, wh_bd, bh_stack)

    return feature, pred_offset


def reference_forward(x, wb, bb, wh, bh):
    """Pure-JAX f32 reference matching the original per-branch GAP->Linear->ReLU->Linear->Tanh."""
    B = x.shape[0]
    pooled = jnp.mean(x.reshape(B, x.shape[1], -1), axis=-1)                   # (B, C)
    feats = jnp.maximum(
        jnp.einsum("bc,mcf->mbf", pooled, wb, precision="highest") + bb, 0.0)  # (4, B, F)
    preds = jnp.tanh(
        jnp.einsum("mbf,mfp->mbp", feats, wh, precision="highest") + bh)       # (4, B, P4)
    feature = jnp.transpose(feats, (1, 0, 2)).reshape(B, -1)
    pred_offset = jnp.transpose(preds, (1, 0, 2)).reshape(B, -1)
    return feature, pred_offset


if __name__ == "__main__":
    # Small synthetic configuration consistent with the module:
    #   in_features = 32 (stand-in for the ResNet feature dim),
    #   num_points = 16  -> each head emits num_points // 4 = 4 values,
    #   linear_init_std = 0.01, dropout acts as identity at inference.
    B, C, H, W = 2, 4, 16, 16
    IN_FEATURES = 32
    NUM_POINTS = 16
    P4 = NUM_POINTS // 4
    N_BRANCH = 4
    LINEAR_INIT_STD = 0.01

    key = jax.random.PRNGKey(0)
    kx, kwb, kwh = jax.random.split(key, 3)

    x = jax.random.normal(kx, (B, C, H, W), dtype=jnp.float32)

    # Backbone (approximated) parameters — deterministic.
    wb = jax.random.normal(kwb, (N_BRANCH, C, IN_FEATURES), dtype=jnp.float32) * 0.1
    bb = jnp.zeros((N_BRANCH, 1, IN_FEATURES), dtype=jnp.float32)

    # PointPredHead parameters: normal(std=linear_init_std) weight, zero bias.
    wh = jax.random.normal(kwh, (N_BRANCH, IN_FEATURES, P4), dtype=jnp.float32) * LINEAR_INIT_STD
    bh = jnp.zeros((N_BRANCH, 1, P4), dtype=jnp.float32)

    # One-time packing (model-load time), hoisted out of the per-call path.
    packed = pack_four_model_params(wb, bb, wh, bh)
    packed = jax.block_until_ready(packed)

    fwd = jax.jit(four_model_forward)
    feature, pred_offset = fwd(x, *packed)
    jax.block_until_ready((feature, pred_offset))

    ref_feature, ref_pred = reference_forward(x, wb, bb, wh, bh)
    assert feature.shape == (B, N_BRANCH * IN_FEATURES)
    assert pred_offset.shape == (B, NUM_POINTS)
    # bf16 matmul operands (f32 accumulation) -> relaxed tolerances vs f32 reference.
    assert jnp.allclose(feature, ref_feature, atol=2e-3, rtol=2e-2)
    assert jnp.allclose(pred_offset, ref_pred, atol=1e-3, rtol=2e-2)

    print("KERNEL_OK")
</pallas_src>

<mosaic_0001>
module attributes {stable_mosaic.version = 11 : i64} {
  func.func @four_model_kernel(%arg0: i32, %arg1: memref<2x4x256xf32, #tpu.memory_space<vmem>>, %arg2: memref<4x128xbf16, #tpu.memory_space<vmem>>, %arg3: memref<1x128xf32, #tpu.memory_space<vmem>>, %arg4: memref<128x16xbf16, #tpu.memory_space<vmem>>, %arg5: memref<1x16xf32, #tpu.memory_space<vmem>>, %arg6: memref<2x128xf32, #tpu.memory_space<vmem>>, %arg7: memref<2x16xf32, #tpu.memory_space<vmem>>) attributes {dimension_semantics = [#tpu.dimension_semantics<arbitrary>], iteration_bounds = array<i64: 1>, scalar_prefetch = 0 : i64, scratch_operands = 0 : i64, tpu.core_type = #tpu.core_type<tc>, window_params = [{pipeline_mode = #tpu.pipeline_mode<synchronous>, transform_indices = @transform_0, window_bounds = array<i64: 2, 4, 256>}, {pipeline_mode = #tpu.pipeline_mode<synchronous>, transform_indices = @transform_1, window_bounds = array<i64: 4, 128>}, {pipeline_mode = #tpu.pipeline_mode<synchronous>, transform_indices = @transform_2, window_bounds = array<i64: 1, 128>}, {pipeline_mode = #tpu.pipeline_mode<synchronous>, transform_indices = @transform_3, window_bounds = array<i64: 128, 16>}, {pipeline_mode = #tpu.pipeline_mode<synchronous>, transform_indices = @transform_4, window_bounds = array<i64: 1, 16>}, {pipeline_mode = #tpu.pipeline_mode<synchronous>, transform_indices = @transform_5, window_bounds = array<i64: 2, 128>}, {pipeline_mode = #tpu.pipeline_mode<synchronous>, transform_indices = @transform_6, window_bounds = array<i64: 2, 16>}]} {
    %c0 = arith.constant 0 : index
    %c0_0 = arith.constant 0 : index
    %c0_1 = arith.constant 0 : index
    %0 = vector.load %arg1[%c0, %c0_0, %c0_1] : memref<2x4x256xf32, #tpu.memory_space<vmem>>, vector<2x4x256xf32>
    %cst = arith.constant dense<0.000000e+00> : vector<2x4xf32>
    %1 = vector.multi_reduction <add>, %0, %cst [2] : vector<2x4x256xf32> to vector<2x4xf32>
    %cst_2 = arith.constant 2.560000e+02 : f32
    %2 = vector.broadcast %cst_2 : f32 to vector<2x4xf32>
    %3 = arith.divf %1, %2 : vector<2x4xf32>
    %4 = arith.truncf %3 : vector<2x4xf32> to vector<2x4xbf16>
    %c0_3 = arith.constant 0 : index
    %c0_4 = arith.constant 0 : index
    %5 = vector.load %arg2[%c0_3, %c0_4] : memref<4x128xbf16, #tpu.memory_space<vmem>>, vector<4x128xbf16>
    %cst_5 = arith.constant dense<0.000000e+00> : vector<2x128xf32>
    %6 = tpu.matmul %4, %5, %cst_5 {dimension_numbers = #tpu.dot_dimension_numbers<[1], [0], [0], [1], [0, 0, 1, 1], [], []>} : vector<2x4xbf16>, vector<4x128xbf16>, vector<2x128xf32> -> vector<2x128xf32>
    %c0_6 = arith.constant 0 : index
    %c0_7 = arith.constant 0 : index
    %7 = vector.load %arg3[%c0_6, %c0_7] : memref<1x128xf32, #tpu.memory_space<vmem>>, vector<1x128xf32>
    %8 = vector.broadcast %7 : vector<1x128xf32> to vector<2x128xf32>
    %9 = arith.addf %6, %8 : vector<2x128xf32>
    %cst_8 = arith.constant 0.000000e+00 : f32
    %10 = vector.broadcast %cst_8 : f32 to vector<2x128xf32>
    %11 = arith.maximumf %9, %10 : vector<2x128xf32>
    %c0_9 = arith.constant 0 : index
    %c0_10 = arith.constant 0 : index
    %12 = vector.load %arg6[%c0_9, %c0_10] : memref<2x128xf32, #tpu.memory_space<vmem>>, vector<2x128xf32>
    tpu.vector_store %arg6[%c0_9, %c0_10], %11 {strides = array<i32>} : memref<2x128xf32, #tpu.memory_space<vmem>>, vector<2x128xf32>,
    %13 = arith.truncf %11 : vector<2x128xf32> to vector<2x128xbf16>
    %c0_11 = arith.constant 0 : index
    %c0_12 = arith.constant 0 : index
    %14 = vector.load %arg4[%c0_11, %c0_12] : memref<128x16xbf16, #tpu.memory_space<vmem>>, vector<128x16xbf16>
    %cst_13 = arith.constant dense<0.000000e+00> : vector<2x16xf32>
    %15 = tpu.matmul %13, %14, %cst_13 {dimension_numbers = #tpu.dot_dimension_numbers<[1], [0], [0], [1], [0, 0, 1, 1], [], []>} : vector<2x128xbf16>, vector<128x16xbf16>, vector<2x16xf32> -> vector<2x16xf32>
    %c0_14 = arith.constant 0 : index
    %c0_15 = arith.constant 0 : index
    %16 = vector.load %arg5[%c0_14, %c0_15] : memref<1x16xf32, #tpu.memory_space<vmem>>, vector<1x16xf32>
    %17 = vector.broadcast %16 : vector<1x16xf32> to vector<2x16xf32>
    %18 = arith.addf %15, %17 : vector<2x16xf32>
    %19 = math.tanh %18 : vector<2x16xf32>
    %c0_16 = arith.constant 0 : index
    %c0_17 = arith.constant 0 : index
    %20 = vector.load %arg7[%c0_16, %c0_17] : memref<2x16xf32, #tpu.memory_space<vmem>>, vector<2x16xf32>
    tpu.vector_store %arg7[%c0_16, %c0_17], %19 {strides = array<i32>} : memref<2x16xf32, #tpu.memory_space<vmem>>, vector<2x16xf32>,
    return
  }
  func.func @transform_0(%arg0: i32) -> (i32, i32, i32) {
    %c0_i32 = arith.constant 0 : i32
    %c0_i32_0 = arith.constant 0 : i32
    %c0_i32_1 = arith.constant 0 : i32
    %c0_i32_2 = arith.constant 0 : i32
    return %c0_i32, %c0_i32_0, %c0_i32_1 : i32, i32, i32
  }
  func.func @transform_1(%arg0: i32) -> (i32, i32) {
    %c0_i32 = arith.constant 0 : i32
    %c0_i32_0 = arith.constant 0 : i32
    %c0_i32_1 = arith.constant 0 : i32
    return %c0_i32, %c0_i32_0 : i32, i32
  }
  func.func @transform_2(%arg0: i32) -> (i32, i32) {
    %c0_i32 = arith.constant 0 : i32
    %c0_i32_0 = arith.constant 0 : i32
    %c0_i32_1 = arith.constant 0 : i32
    return %c0_i32, %c0_i32_0 : i32, i32
  }
  func.func @transform_3(%arg0: i32) -> (i32, i32) {
    %c0_i32 = arith.constant 0 : i32
    %c0_i32_0 = arith.constant 0 : i32
    %c0_i32_1 = arith.constant 0 : i32
    return %c0_i32, %c0_i32_0 : i32, i32
  }
  func.func @transform_4(%arg0: i32) -> (i32, i32) {
    %c0_i32 = arith.constant 0 : i32
    %c0_i32_0 = arith.constant 0 : i32
    %c0_i32_1 = arith.constant 0 : i32
    return %c0_i32, %c0_i32_0 : i32, i32
  }
  func.func @transform_5(%arg0: i32) -> (i32, i32) {
    %c0_i32 = arith.constant 0 : i32
    %c0_i32_0 = arith.constant 0 : i32
    %c0_i32_1 = arith.constant 0 : i32
    return %c0_i32, %c0_i32_0 : i32, i32
  }
  func.func @transform_6(%arg0: i32) -> (i32, i32) {
    %c0_i32 = arith.constant 0 : i32
    %c0_i32_0 = arith.constant 0 : i32
    %c0_i32_1 = arith.constant 0 : i32
    return %c0_i32, %c0_i32_0 : i32, i32
  }
}

</mosaic_0001>

<bundles_post_ra>
// kernel: four_model_forward.1
= control target key start
LH: loop header
LB: loop body
LE: loop exit
PB: predicated region body
PF: predicated region fallthrough
CT: control target
= control target key end

     0   :  { %12 = vsyncpa [#allocation3], 0  ;;  %s403_s0 = inlined_call_operand.vmem [shape: f32[2,4,256], index: 0, kind: input, shape index: {}]   ;;  %s404_s1 = inlined_call_operand.vmem [shape: bf16[4,128], index: 1, kind: input, shape index: {}]   ;;  %s405_s2 = inlined_call_operand.vmem [shape: f32[1,128], index: 2, kind: input, shape index: {}]   ;;  %s406_s3 = inlined_call_operand.vmem [shape: bf16[128,16], index: 3, kind: input, shape index: {}]   ;;  %s407_s4 = inlined_call_operand.vmem [shape: f32[1,16], index: 4, kind: input, shape index: {}]   ;;  %s408_s5 = inlined_call_operand.hbm [shape: f32[2,128], index: 5, kind: output, shape index: {0}]   ;;  %s409_s6 = inlined_call_operand.hbm [shape: f32[2,16], index: 6, kind: output, shape index: {1}]  }
   0x1   :  { %v25_v0 = vld [vmem:[%s403_s0] sm:$0xff]  ;;  %v26_v1 = vld [vmem:[%s403_s0 + $0x8] sm:$0xff] }
   0x2   :  { %29 = vst [vmem:[#allocation1] ss:$2 sm:$0xff] %v25_v0 }
   0x3   :  { %13 = vsyncpa [#allocation5], 0  ;;  %33 = vst [vmem:[#allocation1 + $0x10] ss:$2 sm:$0xff] %v26_v1  ;;  %vm40_vm0 = vcmask 1043456   ;;  %v320_v12 = vmov 256.0   ;;  %v71_v29 = vlaneseq }
   0x4   :  { %264 = vrcp.f32 %v320_v12  ;;  %v62_v14 = vld [vmem:[%s404_s1] sm:$0x3]  ;;  %vm82_vm1 = vcmask 1041408   ;;  %v258_v18 = vld [vmem:[%s406_s3 + $0x38] sm:$0xff]  ;;  %v257_v19 = vld [vmem:[%s406_s3 + $0x30] sm:$0xff]  ;;  %vm75_vm3 = vcmask 1041409  }
   0x5   :  { %v84_v16 = vsel %vm82_vm1, %v62_v14, 0  ;;  %170 = vmatpush.bf16.msra.mxu1 %v258_v18  ;;  %v256_v21 = vld [vmem:[%s406_s3 + $0x28] sm:$0xff]  ;;  %v255_v23 = vld [vmem:[%s406_s3 + $0x20] sm:$0xff]  ;;  %v254_v26 = vld [vmem:[%s406_s3 + $0x18] sm:$0xff]  ;;  %v72_v33 = vand.u32 127, %v71_v29  ;;  %vm78_vm4 = vcmask 31744  }
   0x6   :  { %93 = vmatpush.bf16.msra.mxu0 %v84_v16  ;;  %v253_v28 = vld [vmem:[%s406_s3 + $0x10] sm:$0xff]  ;;  %v252_v41 = vld [vmem:[%s406_s3 + $0x8] sm:$0xff]  ;;  %v251_v42 = vld [vmem:[%s406_s3] sm:$0xff]  ;;  %s193_s21 = sshll.u32 %s408_s5, 4  ;;  %s321_s22 = smov [#allocation2]   ;;  %vm184_vm5 = vcmask 123904   ;;  %s194_s21 = int_to_ptr.hbm [resolvable:$true] %s193_s21 }
   0x7   :  { %v262_v43 = vld [vmem:[%s405_s2] ss:$0 sm:$0xff]  ;;  %s191_s23 = sshll.u32 %s321_s22, 4  ;;  %s322_s2 = smov [#allocation4]   ;;  %s192_s23 = int_to_ptr.vmem [resolvable:$true] %s191_s23 }
   0x8   :  { %v263_v49 = vld [vmem:[%s407_s4] ss:$0 sm:$0xff]  ;;  %s202_s0 = sshll.u32 %s322_s2, 4  ;;  %s204_s27 = sshll.u32 %s409_s6, 4  ;;  %s203_s0 = int_to_ptr.vmem [resolvable:$true] %s202_s0  ;;  %s205_s27 = int_to_ptr.hbm [resolvable:$true] %s204_s27 }
   0x9   :  { %v30_v2 = vld.sshfl [vmem:[#allocation1] sm:$0xff pattern:$0x75316420]  ;;  %v31_v3 = vld.sshfl [vmem:[#allocation1 + $0x8] sm:$0xff pattern:$0x75316420]  ;;  %171 = vmatpush.bf16.msra.mxu1 %v257_v19 }
   0xa   :  { %v41_v4 = vsel %vm40_vm0, %v30_v2, 0.0  ;;  %v42_v5 = vsel %vm40_vm0, %v31_v3, 0.0  ;;  %v34_v7 = vld.sshfl [vmem:[#allocation1 + $0x10] sm:$0xff pattern:$0x75316420]  ;;  %v265_v13 = vpop.eup %264 }
   0xb   :  { %v43_v6 = vadd.f32 %v42_v5, %v41_v4  ;;  %v35_v8 = vld.sshfl [vmem:[#allocation1 + $0x18] sm:$0xff pattern:$0x75316420]  ;;  %v46_v9 = vsel %vm40_vm0, %v34_v7, 0.0  ;;  %v52_v15 = vmul.f32 256.0, %v265_v13  ;;  %vm56_vm2 = vweird.f32 %v265_v13 }
   0xc   :  { %v47_v10 = vsel %vm40_vm0, %v35_v8, 0.0 }
   0xd   :  { %44 = vadd.xlane.f32.xlu0 %v43_v6  ;;  %v48_v11 = vadd.f32 %v47_v10, %v46_v9  ;;  %v53_v17 = vsub.f32 1.0, %v52_v15  ;;  %172 = vmatpush.bf16.msra.mxu1 %v256_v21 }
   0xf   :  { %v54_v20 = vmul.f32 %v265_v13, %v53_v17 }
  0x11   :  { %v55_v22 = vadd.f32 %v265_v13, %v54_v20  ;;  %173 = vmatpush.bf16.msra.mxu1 %v255_v23 }
  0x13   :  { %v57_v24 = vsel %vm56_vm2, %v265_v13, %v55_v22 }
  0x15   :  { %49 = vadd.xlane.f32.xlu0 %v48_v11  ;;  %174 = vmatpush.bf16.msra.mxu1 %v254_v26 }
  0x19   :  { %175 = vmatpush.bf16.msra.mxu1 %v253_v28 }
  0x1d   :  { %176 = vmatpush.bf16.msra.mxu1 %v252_v41 }
  0x21   :  { %177 = vmatpush.bf16.msra.mxu1 %v251_v42 }
  0x80   :  { %v45_v25 = vpop.xlane.xlu0 %44 }
  0x81   :  { %v58_v27 = vmul.f32 %v57_v24, %v45_v25 }
  0x83   :  { %v60_v30 = vpack.c.bf16 %v58_v27, %v58_v27 }
  0x85   :  { %v69_v34 = vunpack.c.l.b16 %v60_v30 }
  0x87   :  { %v73_v37 = vperm.slane %v69_v34, %v72_v33 }
  0x88   :  { %v50_v31 = vpop.xlane.xlu0 %49 }
  0x89   :  { %v59_v32 = vmul.f32 %v57_v24, %v50_v31 }
  0x8b   :  { %v61_v35 = vpack.c.bf16 %v59_v32, %v59_v32 }
  0x8d   :  { %v70_v36 = vunpack.c.l.b16 %v61_v35 }
  0x8f   :  { %v74_v38 = vperm.slane %v70_v36, %v72_v33 }
  0x91   :  { %v76_v39 = vsel %vm75_vm3, %v74_v38, %v73_v37 }
  0x92   :  { %v77_v40 = vpack.c.b16 %v76_v39, %v76_v39 }
  0x94   :  { %218 = vmatmul.msk.bf16.vlgmr.msra.gmra.mxu0 %vm78_vm4, %v77_v40 }
 0x111   :  { %v95_v44 = vpop.f32.mrf.mxu0 }
 0x112   :  { %v96_v45 = vadd.f32 %v262_v43, %v95_v44 }
 0x114   :  { %v99_v46 = vmax.f32 %v96_v45, 0.0 }
 0x116   :  { %100 = vst [vmem:[#allocation2] sm:$0x3] %v99_v46  ;;  %v101_v47 = vpack.c.bf16 %v99_v46, %v99_v46 }
 0x117   :  { %196 = dma.vmem_to_hbm [thread:$0]  %s192_s23, 32, %s194_s21, [#allocation3]  }
 0x118   :  { %178 = vmatmul.bf16.vlgmr.msra.gmra.mxu1 %v101_v47 }
 0x119   :  { %v97_v48 = vpop.f32.mrf.mxu0 }
 0x195   :  { %v179_v50 = vpop.f32.mrf.mxu1 }
 0x196   :  { %v180_v51 = vadd.f32 %v263_v49, %v179_v50 }
 0x198   :  { %266 = vtanh.f32 %v180_v51 }
 0x19d   :  { %v181_v52 = vpop.f32.mrf.mxu1 }
 0x19e   :  { %v267_v53 = vpop.eup %266 }
 0x19f   :  { %185 = vst.msk [vmem:[#allocation4] sm:$0x3] %vm184_vm5, %v267_v53 }
 0x1a0   :  { %207 = dma.vmem_to_hbm [thread:$0]  %s203_s0, 32, %s205_s27, [#allocation5]  }
 0x1a1   :  { %316 = dma.done.wait [#allocation3], 32  }
 0x1a2   :  { %317 = vsyncadd [#allocation3], 4294967264 }
 0x1a3   :  { %318 = dma.done.wait [#allocation5], 32  }
 0x1a4   :  { %319 = vsyncadd [#allocation5], 4294967264 }
 0x1a5   :  { %216 = vsyncpa [#allocation3], 1 }
 0x1a6   :  { %217 = vsyncpa [#allocation5], 1 }

</bundles_post_ra>
